<compile_context>
chip_gen: v7x
topology: tpu7x:2x2x1
jax: 0.10.0
libtpu: 0.0.40
codegen_flags: <defaults>
</compile_context>

<pallas_src>
import functools

import jax
import jax.numpy as jnp
from jax import lax
from jax.experimental import pallas as pl
from jax.experimental.pallas import tpu as pltpu

_EPS = 1e-12  # F.normalize default eps


def _cosine_matmul_kernel(x_ref, w_ref, o_ref):
    # x_ref: (tm, Dp) bf16 unit-norm rows; w_ref: (tn, Dp) bf16 unit-norm rows.
    # Contract the last axes directly (no relayout); f32 accumulation on MXU.
    o_ref[...] = lax.dot_general(
        x_ref[...], w_ref[...],
        dimension_numbers=(((1,), (1,)), ((), ())),
        preferred_element_type=jnp.float32,
    ).astype(o_ref.dtype)


def _round_up(v: int, m: int) -> int:
    return ((v + m - 1) // m) * m


def _choose_tile(dim: int, max_tile: int, unit: int):
    """Pick (tile, padded_dim). tile is a multiple of `unit`, <= max_tile.

    For dim > max_tile we pad dim UP to a multiple of max_tile instead of
    shrinking the tile (keeps arithmetic intensity / avoids W re-read cliffs).
    """
    if dim <= max_tile:
        t = _round_up(dim, unit)
        return t, t
    t = _round_up(max_tile, unit)
    return t, _round_up(dim, t)


def _inv_l2_rows(v: jax.Array) -> jax.Array:
    """Row-wise 1 / max(||v||_2, 1e-12)  (== rsqrt(max(sum v^2, eps^2)))."""
    ss = jnp.sum(v * v, axis=1, keepdims=True)
    return lax.rsqrt(jnp.maximum(ss, _EPS * _EPS))


@functools.partial(jax.jit, static_argnames=("tm_max", "tn_max"))
def normalized_classifier(x: jax.Array, weight: jax.Array,
                          *, tm_max: int = 512, tn_max: int = 512) -> jax.Array:
    """x: [B, D], weight: [C, D] -> cosine logits [B, C] (float32)."""
    B, D = x.shape
    C, D2 = weight.shape
    assert D == D2

    xf = x.astype(jnp.float32)
    wf = weight.astype(jnp.float32)

    # f32 normalization pre-pass (w's is call-static and fuses with padding
    # under jit); cast to bf16 AFTER normalization so the MXU sees
    # well-conditioned unit-norm operands while HBM/DMA bytes are halved.
    xn = (xf * _inv_l2_rows(xf)).astype(jnp.bfloat16)
    wn = (wf * _inv_l2_rows(wf)).astype(jnp.bfloat16)

    # Tile / pad: B at sublane (8), C at lane (128), D padded to 128 lanes.
    tm, Bp = _choose_tile(B, tm_max, 8)
    tn, Cp = _choose_tile(C, tn_max, 128)
    Dp = _round_up(D, 128)

    if (Bp, Dp) != (B, D):
        xn = jnp.pad(xn, ((0, Bp - B), (0, Dp - D)))
    if (Cp, Dp) != (C, D):
        wn = jnp.pad(wn, ((0, Cp - C), (0, Dp - D)))

    grid = (Bp // tm, Cp // tn)
    out = pl.pallas_call(
        _cosine_matmul_kernel,
        out_shape=jax.ShapeDtypeStruct((Bp, Cp), jnp.float32),
        grid_spec=pltpu.PrefetchScalarGridSpec(
            num_scalar_prefetch=0,
            grid=grid,
            in_specs=[
                pl.BlockSpec((tm, Dp), lambda i, j: (i, 0)),   # x tile (resident over j)
                pl.BlockSpec((tn, Dp), lambda i, j: (j, 0)),   # w tile (streamed over j)
            ],
            out_specs=pl.BlockSpec((tm, tn), lambda i, j: (i, j)),
        ),
        compiler_params=pltpu.CompilerParams(
            dimension_semantics=("parallel", "parallel"),
            vmem_limit_bytes=48 * 1024 * 1024,  # > v5e 16 MiB default, < v7x 64 MiB/TC
        ),
    )(xn, wn)

    if (Bp, Cp) != (B, C):
        out = out[:B, :C]
    return out


def init_weight(key, num_classes: int, feature_dim: int) -> jax.Array:
    """Replicates: Tensor(C, D).uniform_(-1, 1).renorm_(2, 0, 1e-05).mul_(1e5)."""
    w = jax.random.uniform(
        key, (num_classes, feature_dim), dtype=jnp.float32, minval=-1.0, maxval=1.0
    )
    row_norm = jnp.linalg.norm(w, axis=1, keepdims=True)
    maxnorm = 1e-05
    scale = jnp.where(row_norm > maxnorm, maxnorm / (row_norm + 1e-7), 1.0)
    return w * scale * 100000.0


def reference(x, w):
    xn = x / jnp.maximum(jnp.linalg.norm(x, axis=1, keepdims=True), _EPS)
    wn = w / jnp.maximum(jnp.linalg.norm(w, axis=1, keepdims=True), _EPS)
    return xn @ wn.T


if __name__ == "__main__":
    key = jax.random.PRNGKey(0)

    # (batch, feature_dim, num_classes): aligned case, ragged case (B/C/D
    # padding paths), and a multi-tile case exercising the 2-D grid + last-tile
    # padding from the fixed tile chooser.
    configs = [(8, 128, 128), (16, 96, 200), (72, 256, 640)]

    for batch, feature_dim, num_classes in configs:
        k_x, k_w, key = jax.random.split(key, 3)
        x = jax.random.normal(k_x, (batch, feature_dim), dtype=jnp.float32)
        weight = init_weight(k_w, num_classes, feature_dim)

        out = jax.block_until_ready(
            normalized_classifier(x, weight, tm_max=64, tn_max=256))
        ref = reference(x, weight)

        assert out.shape == (batch, num_classes)
        # bf16 MXU operands (unit-norm rows) with f32 accumulation.
        err = float(jnp.max(jnp.abs(out - ref)))
        assert jnp.allclose(out, ref, atol=1e-2, rtol=1e-2), f"max abs err {err}"

    print("KERNEL_OK")
</pallas_src>

<mosaic_0001>
module attributes {stable_mosaic.version = 11 : i64} {
  func.func @_cosine_matmul_kernel(%arg0: i32, %arg1: i32, %arg2: memref<8x128xbf16, #tpu.memory_space<vmem>>, %arg3: memref<128x128xbf16, #tpu.memory_space<vmem>>, %arg4: memref<8x128xf32, #tpu.memory_space<vmem>>) attributes {dimension_semantics = [#tpu.dimension_semantics<parallel>, #tpu.dimension_semantics<parallel>], iteration_bounds = array<i64: 1, 1>, scalar_prefetch = 0 : i64, scratch_operands = 0 : i64, tpu.core_type = #tpu.core_type<tc>, window_params = [{transform_indices = @transform_0, window_bounds = array<i64: 8, 128>}, {transform_indices = @transform_1, window_bounds = array<i64: 128, 128>}, {transform_indices = @transform_2, window_bounds = array<i64: 8, 128>}]} {
    %c0 = arith.constant 0 : index
    %c0_0 = arith.constant 0 : index
    %0 = vector.load %arg2[%c0, %c0_0] : memref<8x128xbf16, #tpu.memory_space<vmem>>, vector<8x128xbf16>
    %c0_1 = arith.constant 0 : index
    %c0_2 = arith.constant 0 : index
    %1 = vector.load %arg3[%c0_1, %c0_2] : memref<128x128xbf16, #tpu.memory_space<vmem>>, vector<128x128xbf16>
    %cst = arith.constant dense<0.000000e+00> : vector<8x128xf32>
    %2 = tpu.matmul %0, %1, %cst {dimension_numbers = #tpu.dot_dimension_numbers<[1], [1], [0], [0], [0, 0, 1, 0], [], []>} : vector<8x128xbf16>, vector<128x128xbf16>, vector<8x128xf32> -> vector<8x128xf32>
    %c0_3 = arith.constant 0 : index
    %c0_4 = arith.constant 0 : index
    %3 = vector.load %arg4[%c0_3, %c0_4] : memref<8x128xf32, #tpu.memory_space<vmem>>, vector<8x128xf32>
    tpu.vector_store %arg4[%c0_3, %c0_4], %2 {strides = array<i32>} : memref<8x128xf32, #tpu.memory_space<vmem>>, vector<8x128xf32>,
    return
  }
  func.func @transform_0(%arg0: i32, %arg1: i32) -> (i32, i32) {
    %c0_i32 = arith.constant 0 : i32
    %c0_i32_0 = arith.constant 0 : i32
    return %arg0, %c0_i32 : i32, i32
  }
  func.func @transform_1(%arg0: i32, %arg1: i32) -> (i32, i32) {
    %c0_i32 = arith.constant 0 : i32
    %c0_i32_0 = arith.constant 0 : i32
    return %arg1, %c0_i32 : i32, i32
  }
  func.func @transform_2(%arg0: i32, %arg1: i32) -> (i32, i32) {
    %c0_i32 = arith.constant 0 : i32
    return %arg0, %arg1 : i32, i32
  }
}

</mosaic_0001>

<bundles_post_ra>
// kernel: normalized_classifier.1
= control target key start
LH: loop header
LB: loop body
LE: loop exit
PB: predicated region body
PF: predicated region fallthrough
CT: control target
= control target key end

     0   :  { %v205_v1 = vmov 0.0   ;;  %vm206_vm0 = vmmov 0   ;;  %s262_s0 = inlined_call_operand.vmem [shape: bf16[8,128], index: 0, kind: input, shape index: {}]   ;;  %s263_s1 = inlined_call_operand.vmem [shape: bf16[128,128], index: 1, kind: input, shape index: {}]   ;;  %s264_s2 = inlined_call_operand.hbm [shape: f32[8,128], index: 2, kind: output, shape index: {}]  }
   0x1   :  { %v173_v0 = vld [vmem:[%s263_s1] sm:$0xff]   ;;  %150 = vmatprep.subr.bf16.mxu0 %v205_v1  ;;  %166 = vmatprep.mubr.msk.bf16.mxu0 %vm206_vm0, %v205_v1  ;;  %v174_v2 = vld [vmem:[%s263_s1 + $0x8] sm:$0xff]  }
   0x2   :  { %151 = vmatpush3.bf16.xpose.msra.mxu0 %v173_v0 }
   0x3   :  { %152 = vmatprep.subr.bf16.mxu0 %v205_v1 }
   0x4   :  { %7 = vsyncpa [#allocation3], 0  ;;  %v175_v3 = vld [vmem:[%s263_s1 + $0x10] sm:$0xff]   ;;  %v176_v4 = vld [vmem:[%s263_s1 + $0x18] sm:$0xff]   ;;  %s207_s27 = smov [#allocation2]  }
   0x5   :  { %v177_v5 = vld [vmem:[%s263_s1 + $0x20] sm:$0xff]   ;;  %v178_v6 = vld [vmem:[%s263_s1 + $0x28] sm:$0xff]   ;;  %v179_v7 = vld [vmem:[%s263_s1 + $0x30] sm:$0xff]   ;;  %s125_s28 = sshll.u32 %s207_s27, 4  ;;  %s126_s28 = int_to_ptr.vmem [resolvable:$true] %s125_s28 }
   0x6   :  { %v180_v8 = vld [vmem:[%s263_s1 + $0x38] sm:$0xff]   ;;  %v13_v9 = vld [vmem:[%s262_s0] sm:$0xf]  ;;  %s181_s29 = scalar_lea.vmem %s126_s28, 128  ;;  %p186_p1 = scmp.lt.s32.totalorder %s126_s28, %s126_s28 }
   0x7   :  { %p182_p0 = scmp.ne.s32.totalorder %s126_s28, %s181_s29  ;;  %p187_p2 = scmp.lt.s32.totalorder %s181_s29, %s181_s29 }
   0x9   :  { %p188_p3 = por %p187_p2, %p186_p1 }
   0xa   :  { %153 = vmatpush3.bf16.xpose.msra.mxu0 %v174_v2 }
   0xb   :  { %154 = vmatprep.subr.bf16.mxu0 %v205_v1  ;;  %p189_p4 = pnand %p188_p3, %p182_p0 }
  0x12   :  { %155 = vmatpush3.bf16.xpose.msra.mxu0 %v175_v3 }
  0x13   :  { %156 = vmatprep.subr.bf16.mxu0 %v205_v1 }
  0x1a   :  { %157 = vmatpush3.bf16.xpose.msra.mxu0 %v176_v4 }
  0x1b   :  { %158 = vmatprep.subr.bf16.mxu0 %v205_v1 }
  0x22   :  { %159 = vmatpush3.bf16.xpose.msra.mxu0 %v177_v5 }
  0x23   :  { %160 = vmatprep.subr.bf16.mxu0 %v205_v1 }
  0x2a   :  { %161 = vmatpush3.bf16.xpose.msra.mxu0 %v178_v6 }
  0x2b   :  { %162 = vmatprep.subr.bf16.mxu0 %v205_v1 }
  0x32   :  { %163 = vmatpush3.bf16.xpose.msra.mxu0 %v179_v7 }
  0x33   :  { %164 = vmatprep.subr.bf16.mxu0 %v205_v1 }
  0x3a   :  { %165 = vmatpush3.bf16.xpose.msra.mxu0 %v180_v8 }
  0x41   :  { %167 = vmatmul.mubr.bf16.vlgmr.msra.gmra.mrb[0].mxu0 %v13_v9 }
 0x114   :  { %v112_v10 = vpop.f32.mrb[0].mxu0 }
 0x115   :  { %118 = vst [vmem:[#allocation2] sm:$0xff] %v112_v10  ;;  %v168_v11 = vpop.f32.mrb[1].mxu0 }
 0x116   :  { %v115_v12 = vpop.f32.mrb[2].mxu0 }
 0x117   :  { %192 = shalt.err (!%p189_p4)
}
 0x118   :  { %s193_s3 = scalar_lea.hbm %s264_s2, 128 }
 0x119   :  { %p194_p5 = scmp.ne.s32.totalorder %s264_s2, %s193_s3  ;;  %p197_p6 = scmp.lt.u32.totalorder %s193_s3, %s264_s2 }
 0x11b   :  { %p199_p7 = pnand %p197_p6, %p194_p5 }
 0x11d   :  { %202 = shalt.err (!%p199_p7)
}
 0x11e   :  { %128 = dma.vmem_to_hbm [thread:$0]  %s126_s28, 128, %s264_s2, [#allocation3]   ;;  %v169_v13 = vpop.f32.mrb[3].mxu0 }
 0x11f   :  { %203 = dma.done.wait [#allocation3], 128  }
 0x120   :  { %204 = vsyncadd [#allocation3], 4294967168 }
 0x121   :  { %132 = vsyncpa [#allocation3], 1 }

</bundles_post_ra>
